<compile_context>
chip_gen: v5e
topology: v5e:2x2
jax: 0.10.0
libtpu: 0.0.40
codegen_flags: <defaults>
</compile_context>

<pallas_src>
import jax
import jax.numpy as jnp
from jax.experimental import pallas as pl
from jax.experimental.pallas import tpu as pltpu


def _latent_kernel(users_ref, jokes_ref,          # (TB, 1) int32 per-tile indices
                   mu_u_ref, sg_u_ref,            # (N, K) bf16 tables (VMEM-resident)
                   mu_v_ref, sg_v_ref,            # (J, K) bf16 tables (VMEM-resident)
                   zu_ref, zv_ref,                # (TB, K) bf16 reparam noise tiles
                   o_ref):                        # (TB, 1) f32 output tile
    tb, _ = zu_ref.shape
    n = mu_u_ref.shape[0]
    j = mu_v_ref.shape[0]

    # In-kernel gather of the embedding rows: one-hot (TB,N)/(TB,J) built with a
    # vectorized compare, then matmuls on the otherwise-idle MXU.  f32 accumulate
    # makes the selection exact (1.0 * bf16 value).
    oh_u = jnp.where(
        jax.lax.broadcasted_iota(jnp.int32, (tb, n), 1) == users_ref[...],
        1.0, 0.0).astype(jnp.bfloat16)
    oh_v = jnp.where(
        jax.lax.broadcasted_iota(jnp.int32, (tb, j), 1) == jokes_ref[...],
        1.0, 0.0).astype(jnp.bfloat16)

    mu_u = jnp.dot(oh_u, mu_u_ref[...], preferred_element_type=jnp.float32)  # (TB, K)
    sg_u = jnp.dot(oh_u, sg_u_ref[...], preferred_element_type=jnp.float32)
    mu_v = jnp.dot(oh_v, mu_v_ref[...], preferred_element_type=jnp.float32)
    sg_v = jnp.dot(oh_v, sg_v_ref[...], preferred_element_type=jnp.float32)

    # Reparameterize (f32 VPU FMAs) and reduce over K in f32.
    u = zu_ref[...].astype(jnp.float32) * sg_u + mu_u
    v = zv_ref[...].astype(jnp.float32) * sg_v + mu_v
    o_ref[...] = jnp.sum(u * v, axis=1, keepdims=True)


def latent_linear_forward(users, jokes, mu_U, logvar_U, mu_V, logvar_V, z_U, z_V,
                          *, tb=4096):
    """users, jokes: (B,) int32.  mu/logvar tables: (N,K)/(J,K) f32.  z_*: (B,K) f32."""
    B, K = z_U.shape
    N = mu_U.shape[0]
    J = mu_V.shape[0]

    # sigma = sqrt(exp(logvar)) hoisted once over the tiny tables (EUP work out
    # of the hot path); tables stored bf16 so they stay small in VMEM (v7x).
    mu_u_t = mu_U.astype(jnp.bfloat16)
    sg_u_t = jnp.exp(0.5 * logvar_U).astype(jnp.bfloat16)
    mu_v_t = mu_V.astype(jnp.bfloat16)
    sg_v_t = jnp.exp(0.5 * logvar_V).astype(jnp.bfloat16)

    # bf16 transport for the dominant HBM streams; compute stays f32 in-kernel.
    zu = z_U.astype(jnp.bfloat16)
    zv = z_V.astype(jnp.bfloat16)
    users2 = users.reshape(B, 1).astype(jnp.int32)
    jokes2 = jokes.reshape(B, 1).astype(jnp.int32)

    # Big batch tiles amortize per-step grid overhead; don't over-pad tiny batches.
    tb = max(128, min(tb, pl.cdiv(B, 128) * 128))
    n_tiles = pl.cdiv(B, tb)
    Bp = n_tiles * tb
    pad = Bp - B
    if pad:
        zu = jnp.pad(zu, ((0, pad), (0, 0)))
        zv = jnp.pad(zv, ((0, pad), (0, 0)))
        users2 = jnp.pad(users2, ((0, pad), (0, 0)))   # index 0 is valid; rows sliced off
        jokes2 = jnp.pad(jokes2, ((0, pad), (0, 0)))

    idx_spec = pl.BlockSpec((tb, 1), lambda i: (i, 0))
    z_spec = pl.BlockSpec((tb, K), lambda i: (i, 0))
    tab_u_spec = pl.BlockSpec((N, K), lambda i: (0, 0))   # resident for the whole grid
    tab_v_spec = pl.BlockSpec((J, K), lambda i: (0, 0))

    bytes_accessed = (2 * Bp * K * 2          # z_U, z_V (bf16)
                      + 2 * Bp * 4            # indices
                      + 2 * (N + J) * K * 2   # resident tables
                      + Bp * 4)               # output
    flops = 4 * Bp * K * (N + J) + 8 * Bp * K

    out = pl.pallas_call(
        _latent_kernel,
        out_shape=jax.ShapeDtypeStruct((Bp, 1), jnp.float32),
        grid_spec=pltpu.PrefetchScalarGridSpec(
            num_scalar_prefetch=0,
            grid=(n_tiles,),
            in_specs=[idx_spec, idx_spec,
                      tab_u_spec, tab_u_spec, tab_v_spec, tab_v_spec,
                      z_spec, z_spec],
            out_specs=pl.BlockSpec((tb, 1), lambda i: (i, 0)),
        ),
        compiler_params=pltpu.CompilerParams(
            # TODO(synk): on v7x try pltpu.CORE_PARALLEL here (or an explicit
            # core split) to shard batch tiles across both TensorCores;
            # "parallel" is a safe no-op on the single-TC v5e/v6e.
            dimension_semantics=("parallel",),
            vmem_limit_bytes=32 * 1024 * 1024,
        ),
        cost_estimate=pl.CostEstimate(flops=flops, transcendentals=0,
                                      bytes_accessed=bytes_accessed),
    )(users2, jokes2, mu_u_t, sg_u_t, mu_v_t, sg_v_t, zu, zv)

    return out[:B, 0]   # (B,) — matches torch .squeeze()


if __name__ == "__main__":
    # Small shapes consistent with the module: K latent dim, N users, J jokes.
    K, N, J, B = 32, 16, 12, 8

    key = jax.random.PRNGKey(0)
    k_mu_u, k_mu_v, k_users, k_jokes, k_zu, k_zv = jax.random.split(key, 6)

    # Parameter init mirroring nn.Embedding default (N(0,1)) and fill_(-10).
    mu_U = jax.random.normal(k_mu_u, (N, K), dtype=jnp.float32)
    logvar_U = jnp.full((N, K), -10.0, dtype=jnp.float32)
    mu_V = jax.random.normal(k_mu_v, (J, K), dtype=jnp.float32)
    logvar_V = jnp.full((J, K), -10.0, dtype=jnp.float32)

    users = jax.random.randint(k_users, (B,), 0, N, dtype=jnp.int32)
    jokes = jax.random.randint(k_jokes, (B,), 0, J, dtype=jnp.int32)

    # TODO(synk): torch draws fresh np.random.normal noise each forward; here the
    # reparameterization noise is a deterministic explicit input.
    z_U = jax.random.normal(k_zu, (B, K), dtype=jnp.float32)
    z_V = jax.random.normal(k_zv, (B, K), dtype=jnp.float32)

    r = jax.jit(latent_linear_forward)(users, jokes, mu_U, logvar_U,
                                       mu_V, logvar_V, z_U, z_V)
    r = jax.block_until_ready(r)
    assert r.shape == (B,)

    # Strict check: f32 reference fed the same bf16-rounded values the kernel sees.
    rd = lambda a: a.astype(jnp.bfloat16).astype(jnp.float32)
    sig_U = jnp.exp(0.5 * logvar_U)
    sig_V = jnp.exp(0.5 * logvar_V)
    u_ref = rd(z_U) * rd(sig_U)[users] + rd(mu_U)[users]
    v_ref = rd(z_V) * rd(sig_V)[jokes] + rd(mu_V)[jokes]
    r_strict = jnp.sum(u_ref * v_ref, axis=-1)
    assert jnp.allclose(r, r_strict, atol=1e-3, rtol=1e-3), (r, r_strict)

    # Loose check vs. the pure-f32 reference (bf16-transport tolerance).
    u_f32 = z_U * jnp.sqrt(jnp.exp(logvar_U[users])) + mu_U[users]
    v_f32 = z_V * jnp.sqrt(jnp.exp(logvar_V[jokes])) + mu_V[jokes]
    r_f32 = jnp.sum(u_f32 * v_f32, axis=-1)
    assert jnp.allclose(r, r_f32, atol=5e-2, rtol=5e-2), (r, r_f32)

    print("KERNEL_OK")
</pallas_src>

<mosaic_0001>
module attributes {stable_mosaic.version = 11 : i64} {
  func.func @_latent_kernel(%arg0: i32, %arg1: memref<128x1xi32, #tpu.memory_space<vmem>>, %arg2: memref<128x1xi32, #tpu.memory_space<vmem>>, %arg3: memref<16x32xbf16, #tpu.memory_space<vmem>>, %arg4: memref<16x32xbf16, #tpu.memory_space<vmem>>, %arg5: memref<12x32xbf16, #tpu.memory_space<vmem>>, %arg6: memref<12x32xbf16, #tpu.memory_space<vmem>>, %arg7: memref<128x32xbf16, #tpu.memory_space<vmem>>, %arg8: memref<128x32xbf16, #tpu.memory_space<vmem>>, %arg9: memref<128x1xf32, #tpu.memory_space<vmem>>) attributes {dimension_semantics = [#tpu.dimension_semantics<parallel>], iteration_bounds = array<i64: 1>, scalar_prefetch = 0 : i64, scratch_operands = 0 : i64, tpu.core_type = #tpu.core_type<tc>, window_params = [{transform_indices = @transform_0, window_bounds = array<i64: 128, 1>}, {transform_indices = @transform_1, window_bounds = array<i64: 128, 1>}, {pipeline_mode = #tpu.pipeline_mode<synchronous>, transform_indices = @transform_2, window_bounds = array<i64: 16, 32>}, {pipeline_mode = #tpu.pipeline_mode<synchronous>, transform_indices = @transform_3, window_bounds = array<i64: 16, 32>}, {pipeline_mode = #tpu.pipeline_mode<synchronous>, transform_indices = @transform_4, window_bounds = array<i64: 12, 32>}, {pipeline_mode = #tpu.pipeline_mode<synchronous>, transform_indices = @transform_5, window_bounds = array<i64: 12, 32>}, {transform_indices = @transform_6, window_bounds = array<i64: 128, 32>}, {transform_indices = @transform_7, window_bounds = array<i64: 128, 32>}, {transform_indices = @transform_8, window_bounds = array<i64: 128, 1>}]} {
    %0 = tpu.iota {dimensions = array<i32: 1>} : vector<128x16xi32>
    %c0 = arith.constant 0 : index
    %c0_0 = arith.constant 0 : index
    %1 = vector.load %arg1[%c0, %c0_0] : memref<128x1xi32, #tpu.memory_space<vmem>>, vector<128x1xi32>
    %2 = vector.broadcast %1 : vector<128x1xi32> to vector<128x16xi32>
    %3 = arith.cmpi eq, %0, %2 : vector<128x16xi32>
    %cst = arith.constant 1.000000e+00 : f32
    %cst_1 = arith.constant 0.000000e+00 : f32
    %4 = vector.broadcast %cst : f32 to vector<128x16xf32>
    %5 = vector.broadcast %cst_1 : f32 to vector<128x16xf32>
    %6 = arith.select %3, %4, %5 : vector<128x16xi1>, vector<128x16xf32>
    %7 = arith.truncf %6 : vector<128x16xf32> to vector<128x16xbf16>
    %8 = tpu.iota {dimensions = array<i32: 1>} : vector<128x12xi32>
    %c0_2 = arith.constant 0 : index
    %c0_3 = arith.constant 0 : index
    %9 = vector.load %arg2[%c0_2, %c0_3] : memref<128x1xi32, #tpu.memory_space<vmem>>, vector<128x1xi32>
    %10 = vector.broadcast %9 : vector<128x1xi32> to vector<128x12xi32>
    %11 = arith.cmpi eq, %8, %10 : vector<128x12xi32>
    %cst_4 = arith.constant 1.000000e+00 : f32
    %cst_5 = arith.constant 0.000000e+00 : f32
    %12 = vector.broadcast %cst_4 : f32 to vector<128x12xf32>
    %13 = vector.broadcast %cst_5 : f32 to vector<128x12xf32>
    %14 = arith.select %11, %12, %13 : vector<128x12xi1>, vector<128x12xf32>
    %15 = arith.truncf %14 : vector<128x12xf32> to vector<128x12xbf16>
    %c0_6 = arith.constant 0 : index
    %c0_7 = arith.constant 0 : index
    %16 = vector.load %arg3[%c0_6, %c0_7] : memref<16x32xbf16, #tpu.memory_space<vmem>>, vector<16x32xbf16>
    %cst_8 = arith.constant dense<0.000000e+00> : vector<128x32xf32>
    %17 = tpu.matmul %7, %16, %cst_8 {dimension_numbers = #tpu.dot_dimension_numbers<[1], [0], [0], [1], [0, 0, 1, 1], [], []>} : vector<128x16xbf16>, vector<16x32xbf16>, vector<128x32xf32> -> vector<128x32xf32>
    %c0_9 = arith.constant 0 : index
    %c0_10 = arith.constant 0 : index
    %18 = vector.load %arg4[%c0_9, %c0_10] : memref<16x32xbf16, #tpu.memory_space<vmem>>, vector<16x32xbf16>
    %cst_11 = arith.constant dense<0.000000e+00> : vector<128x32xf32>
    %19 = tpu.matmul %7, %18, %cst_11 {dimension_numbers = #tpu.dot_dimension_numbers<[1], [0], [0], [1], [0, 0, 1, 1], [], []>} : vector<128x16xbf16>, vector<16x32xbf16>, vector<128x32xf32> -> vector<128x32xf32>
    %c0_12 = arith.constant 0 : index
    %c0_13 = arith.constant 0 : index
    %20 = vector.load %arg5[%c0_12, %c0_13] : memref<12x32xbf16, #tpu.memory_space<vmem>>, vector<12x32xbf16>
    %cst_14 = arith.constant dense<0.000000e+00> : vector<128x32xf32>
    %21 = tpu.matmul %15, %20, %cst_14 {dimension_numbers = #tpu.dot_dimension_numbers<[1], [0], [0], [1], [0, 0, 1, 1], [], []>} : vector<128x12xbf16>, vector<12x32xbf16>, vector<128x32xf32> -> vector<128x32xf32>
    %c0_15 = arith.constant 0 : index
    %c0_16 = arith.constant 0 : index
    %22 = vector.load %arg6[%c0_15, %c0_16] : memref<12x32xbf16, #tpu.memory_space<vmem>>, vector<12x32xbf16>
    %cst_17 = arith.constant dense<0.000000e+00> : vector<128x32xf32>
    %23 = tpu.matmul %15, %22, %cst_17 {dimension_numbers = #tpu.dot_dimension_numbers<[1], [0], [0], [1], [0, 0, 1, 1], [], []>} : vector<128x12xbf16>, vector<12x32xbf16>, vector<128x32xf32> -> vector<128x32xf32>
    %c0_18 = arith.constant 0 : index
    %c0_19 = arith.constant 0 : index
    %24 = vector.load %arg7[%c0_18, %c0_19] : memref<128x32xbf16, #tpu.memory_space<vmem>>, vector<128x32xbf16>
    %25 = arith.extf %24 : vector<128x32xbf16> to vector<128x32xf32>
    %26 = arith.mulf %25, %19 : vector<128x32xf32>
    %27 = arith.addf %26, %17 : vector<128x32xf32>
    %c0_20 = arith.constant 0 : index
    %c0_21 = arith.constant 0 : index
    %28 = vector.load %arg8[%c0_20, %c0_21] : memref<128x32xbf16, #tpu.memory_space<vmem>>, vector<128x32xbf16>
    %29 = arith.extf %28 : vector<128x32xbf16> to vector<128x32xf32>
    %30 = arith.mulf %29, %23 : vector<128x32xf32>
    %31 = arith.addf %30, %21 : vector<128x32xf32>
    %32 = arith.mulf %27, %31 : vector<128x32xf32>
    %cst_22 = arith.constant dense<0.000000e+00> : vector<128xf32>
    %33 = vector.multi_reduction <add>, %32, %cst_22 [1] : vector<128x32xf32> to vector<128xf32>
    %34 = vector.shape_cast %33 : vector<128xf32> to vector<128x1xf32>
    %c0_23 = arith.constant 0 : index
    %c0_24 = arith.constant 0 : index
    %35 = vector.load %arg9[%c0_23, %c0_24] : memref<128x1xf32, #tpu.memory_space<vmem>>, vector<128x1xf32>
    tpu.vector_store %arg9[%c0_23, %c0_24], %34 {strides = array<i32>} : memref<128x1xf32, #tpu.memory_space<vmem>>, vector<128x1xf32>,
    return
  }
  func.func @transform_0(%arg0: i32) -> (i32, i32) {
    %c0_i32 = arith.constant 0 : i32
    %c0_i32_0 = arith.constant 0 : i32
    return %arg0, %c0_i32 : i32, i32
  }
  func.func @transform_1(%arg0: i32) -> (i32, i32) {
    %c0_i32 = arith.constant 0 : i32
    %c0_i32_0 = arith.constant 0 : i32
    return %arg0, %c0_i32 : i32, i32
  }
  func.func @transform_2(%arg0: i32) -> (i32, i32) {
    %c0_i32 = arith.constant 0 : i32
    %c0_i32_0 = arith.constant 0 : i32
    %c0_i32_1 = arith.constant 0 : i32
    return %c0_i32, %c0_i32_0 : i32, i32
  }
  func.func @transform_3(%arg0: i32) -> (i32, i32) {
    %c0_i32 = arith.constant 0 : i32
    %c0_i32_0 = arith.constant 0 : i32
    %c0_i32_1 = arith.constant 0 : i32
    return %c0_i32, %c0_i32_0 : i32, i32
  }
  func.func @transform_4(%arg0: i32) -> (i32, i32) {
    %c0_i32 = arith.constant 0 : i32
    %c0_i32_0 = arith.constant 0 : i32
    %c0_i32_1 = arith.constant 0 : i32
    return %c0_i32, %c0_i32_0 : i32, i32
  }
  func.func @transform_5(%arg0: i32) -> (i32, i32) {
    %c0_i32 = arith.constant 0 : i32
    %c0_i32_0 = arith.constant 0 : i32
    %c0_i32_1 = arith.constant 0 : i32
    return %c0_i32, %c0_i32_0 : i32, i32
  }
  func.func @transform_6(%arg0: i32) -> (i32, i32) {
    %c0_i32 = arith.constant 0 : i32
    %c0_i32_0 = arith.constant 0 : i32
    return %arg0, %c0_i32 : i32, i32
  }
  func.func @transform_7(%arg0: i32) -> (i32, i32) {
    %c0_i32 = arith.constant 0 : i32
    %c0_i32_0 = arith.constant 0 : i32
    return %arg0, %c0_i32 : i32, i32
  }
  func.func @transform_8(%arg0: i32) -> (i32, i32) {
    %c0_i32 = arith.constant 0 : i32
    %c0_i32_0 = arith.constant 0 : i32
    return %arg0, %c0_i32 : i32, i32
  }
}

</mosaic_0001>

<bundles_post_ra>
// kernel: latent_linear_forward.1
= control target key start
LH: loop header
LB: loop body
LE: loop exit
PB: predicated region body
PF: predicated region fallthrough
CT: control target
= control target key end

     0   :  { %v872_v0 = vmov 0   ;;  %vm411_vm0 = vcmask 1045504   ;;  %v30_v43 = vlaneseq  ;;  %vm248_vm5 = vcmask 130048   ;;  %s1259_s1 = inlined_call_operand.vmem [shape: s32[128,1], index: 1, kind: input, shape index: {}]   ;;  %s1260_s0 = inlined_call_operand.vmem [shape: s32[128,1], index: 0, kind: input, shape index: {}]   ;;  %s1261_s4 = inlined_call_operand.vmem [shape: bf16[12,32], index: 4, kind: input, shape index: {}]   ;;  %s1262_s5 = inlined_call_operand.vmem [shape: bf16[12,32], index: 5, kind: input, shape index: {}]   ;;  %s1263_s2 = inlined_call_operand.vmem [shape: bf16[16,32], index: 2, kind: input, shape index: {}]   ;;  %s1264_s3 = inlined_call_operand.vmem [shape: bf16[16,32], index: 3, kind: input, shape index: {}]   ;;  %s1265_s6 = inlined_call_operand.vmem [shape: bf16[128,32], index: 6, kind: input, shape index: {}]   ;;  %s1266_s7 = inlined_call_operand.vmem [shape: bf16[128,32], index: 7, kind: input, shape index: {}]   ;;  %s1267_s8 = inlined_call_operand.vmem [shape: f32[128,1], index: 8, kind: output, shape index: {}]  }
   0x1   :  { %871 = vset.pattern.permute.xlu2 %v872_v0  ;;  %870 = vset.pattern.permute.xlu1 %v872_v0  ;;  %v138_v1 = vld [vmem:[%s1259_s1 + $0x10] sm:$0xff]  ;;  %v136_v2 = vld [vmem:[%s1259_s1] sm:$0xff]  ;;  %v139_v4 = vld [vmem:[%s1259_s1 + $0x18] sm:$0xff]  ;;  %v873_v50 = vmov 0.0   ;;  %vm386_vm6 = vcmask 97280  }
   0x2   :  { %v32_v3 = vld [vmem:[%s1260_s0] sm:$0xff]  ;;  %869 = vset.pattern.permute.xlu0 %v872_v0  ;;  %159 = vperm.xlu2 %871, %v138_v1   ;;  %v137_v5 = vld [vmem:[%s1259_s1 + $0x8] sm:$0xff]  ;;  %v34_v8 = vld [vmem:[%s1260_s0 + $0x10] sm:$0xff]  ;;  %v1033_v46 = vand.u32 127, %v30_v43 }
   0x3   :  { %153 = vperm.xlu0 %869, %v136_v2   ;;  %49 = vperm.xlu1 %870, %v32_v3   ;;  %v33_v6 = vld [vmem:[%s1260_s0 + $0x8] sm:$0xff]  ;;  %v140_v7 = vld [vmem:[%s1259_s1 + $0x20] sm:$0xff]  ;;  %v35_v9 = vld [vmem:[%s1260_s0 + $0x18] sm:$0xff] }
   0x4   :  { %v37_v10 = vld [vmem:[%s1260_s0 + $0x28] sm:$0xff]  ;;  %v36_v12 = vld [vmem:[%s1260_s0 + $0x20] sm:$0xff]  ;;  %v38_v13 = vld [vmem:[%s1260_s0 + $0x30] sm:$0xff] }
   0x5   :  { %v141_v11 = vld [vmem:[%s1259_s1 + $0x28] sm:$0xff]  ;;  %v142_v14 = vld [vmem:[%s1259_s1 + $0x30] sm:$0xff]  ;;  %v143_v15 = vld [vmem:[%s1259_s1 + $0x38] sm:$0xff] }
   0x6   :  { %v145_v16 = vld [vmem:[%s1259_s1 + $0x48] sm:$0xff]  ;;  %v39_v17 = vld [vmem:[%s1260_s0 + $0x38] sm:$0xff]  ;;  %v144_v18 = vld [vmem:[%s1259_s1 + $0x40] sm:$0xff] }
   0x7   :  { %v146_v19 = vld [vmem:[%s1259_s1 + $0x50] sm:$0xff]  ;;  %v40_v20 = vld [vmem:[%s1260_s0 + $0x40] sm:$0xff]  ;;  %v41_v21 = vld [vmem:[%s1260_s0 + $0x48] sm:$0xff] }
   0x8   :  { %v43_v22 = vld [vmem:[%s1260_s0 + $0x58] sm:$0xff]  ;;  %v42_v24 = vld [vmem:[%s1260_s0 + $0x50] sm:$0xff]  ;;  %v44_v25 = vld [vmem:[%s1260_s0 + $0x60] sm:$0xff] }
   0x9   :  { %v147_v23 = vld [vmem:[%s1259_s1 + $0x58] sm:$0xff]  ;;  %v148_v26 = vld [vmem:[%s1259_s1 + $0x60] sm:$0xff]  ;;  %v149_v27 = vld [vmem:[%s1259_s1 + $0x68] sm:$0xff] }
   0xa   :  { %162 = vperm.xlu2 %871, %v139_v4   ;;  %v151_v28 = vld [vmem:[%s1259_s1 + $0x78] sm:$0xff]  ;;  %v45_v29 = vld [vmem:[%s1260_s0 + $0x68] sm:$0xff]  ;;  %v150_v30 = vld [vmem:[%s1259_s1 + $0x70] sm:$0xff] }
   0xb   :  { %156 = vperm.xlu0 %869, %v137_v5   ;;  %52 = vperm.xlu1 %870, %v33_v6   ;;  %v46_v31 = vld [vmem:[%s1260_s0 + $0x70] sm:$0xff]  ;;  %v47_v32 = vld [vmem:[%s1260_s0 + $0x78] sm:$0xff]  ;;  %v763_v33 = vld [vmem:[%s1261_s4] sm:$0xf] }
   0xc   :  { %v787_v34 = vld [vmem:[%s1261_s4] sm:$0x30]  ;;  %v775_v35 = vld [vmem:[%s1262_s5] sm:$0xf] }
   0xd   :  { %v764_v36 = vor.u32 %v787_v34, %v763_v33  ;;  %v788_v37 = vld [vmem:[%s1262_s5] sm:$0x30] }
   0xe   :  { %v785_v38 = vld [vmem:[%s1263_s2] sm:$0xff]  ;;  %v776_v40 = vor.u32 %v788_v37, %v775_v35 }
   0xf   :  { %v786_v39 = vld [vmem:[%s1264_s3] sm:$0xff]  ;;  %v413_v41 = vsel %vm411_vm0, %v764_v36, 0  ;;  %280 = vmatpush.bf16.msra.mxu0 %v785_v38 }
  0x10   :  { %337 = vmatpush.bf16.msra.mxu1 %v786_v39  ;;  %v472_v42 = vsel %vm411_vm0, %v776_v40, 0  ;;  %422 = vmatpush.bf16.msra.mxu2 %v413_v41 }
  0x11   :  { %481 = vmatpush.bf16.msra.mxu3 %v472_v42 }
  0x12   :  { %165 = vperm.xlu2 %871, %v140_v7  }
  0x13   :  { %55 = vperm.xlu0 %869, %v34_v8   ;;  %58 = vperm.xlu1 %870, %v35_v9  }
  0x1a   :  { %64 = vperm.xlu2 %871, %v37_v10  }
  0x1b   :  { %168 = vperm.xlu0 %869, %v141_v11   ;;  %61 = vperm.xlu1 %870, %v36_v12  }
  0x22   :  { %67 = vperm.xlu2 %871, %v38_v13  }
  0x23   :  { %171 = vperm.xlu0 %869, %v142_v14   ;;  %174 = vperm.xlu1 %870, %v143_v15  }
  0x2a   :  { %180 = vperm.xlu2 %871, %v145_v16  }
  0x2b   :  { %70 = vperm.xlu0 %869, %v39_v17   ;;  %177 = vperm.xlu1 %870, %v144_v18  }
  0x32   :  { %183 = vperm.xlu2 %871, %v146_v19  }
  0x33   :  { %73 = vperm.xlu0 %869, %v40_v20   ;;  %76 = vperm.xlu1 %870, %v41_v21  }
  0x3a   :  { %82 = vperm.xlu2 %871, %v43_v22  }
  0x3b   :  { %186 = vperm.xlu0 %869, %v147_v23   ;;  %79 = vperm.xlu1 %870, %v42_v24  }
  0x42   :  { %85 = vperm.xlu2 %871, %v44_v25  }
  0x43   :  { %189 = vperm.xlu0 %869, %v148_v26   ;;  %192 = vperm.xlu1 %870, %v149_v27  }
  0x4a   :  { %198 = vperm.xlu2 %871, %v151_v28  }
  0x4b   :  { %88 = vperm.xlu0 %869, %v45_v29   ;;  %195 = vperm.xlu1 %870, %v150_v30  }
  0x53   :  { %91 = vperm.xlu0 %869, %v46_v31   ;;  %94 = vperm.xlu1 %870, %v47_v32  }
  0x5c   :  { %v160_v47 = vpop.permute.xlu2 %159 }
  0x5d   :  { %vm202_vm9 = vcmp.eq.s32.totalorder %v1033_v46, %v160_v47 }
  0x5e   :  { %v218_v62 = vsel %vm202_vm9, 1.0, %v873_v50 }
  0x64   :  { %v163_v57 = vpop.permute.xlu2 %162 }
  0x65   :  { %vm203_vm10 = vcmp.eq.s32.totalorder %v1033_v46, %v163_v57 }
  0x66   :  { %v219_v63 = vsel %vm203_vm10, 1.0, %v873_v50 }
  0x67   :  { %v233_v1 = vpack.c.bf16 %v219_v63, %v218_v62 }
  0x6c   :  { %v166_v2 = vpop.permute.xlu2 %165 }
  0x6d   :  { %vm204_vm14 = vcmp.eq.s32.totalorder %v1033_v46, %v166_v2 }
  0x6e   :  { %v220_v10 = vsel %vm204_vm14, 1.0, %v873_v50 }
  0x74   :  { %v65_v5 = vpop.permute.xlu2 %64 }
  0x75   :  { %v154_v44 = vpop.permute.xlu0 %153  ;;  %v50_v45 = vpop.permute.xlu1 %49  ;;  %vm101_vm13 = vcmp.eq.s32.totalorder %v1033_v46, %v65_v5 }
  0x76   :  { %vm200_vm1 = vcmp.eq.s32.totalorder %v1033_v46, %v154_v44  ;;  %vm96_vm2 = vcmp.eq.s32.totalorder %v1033_v46, %v50_v45  ;;  %v117_v9 = vsel %vm101_vm13, 1.0, %v873_v50 }
  0x77   :  { %v216_v51 = vsel %vm200_vm1, 1.0, %v873_v50  ;;  %v112_v52 = vsel %vm96_vm2, 1.0, %v873_v50 }
  0x7c   :  { %v68_v15 = vpop.permute.xlu2 %67 }
  0x7d   :  { %v157_v48 = vpop.permute.xlu0 %156  ;;  %v53_v49 = vpop.permute.xlu1 %52  ;;  %vm102_vm2 = vcmp.eq.s32.totalorder %v1033_v46, %v68_v15 }
  0x7e   :  { %vm201_vm3 = vcmp.eq.s32.totalorder %v1033_v46, %v157_v48  ;;  %vm97_vm4 = vcmp.eq.s32.totalorder %v1033_v46, %v53_v49  ;;  %v118_v20 = vsel %vm102_vm2, 1.0, %v873_v50 }
  0x7f   :  { %v217_v53 = vsel %vm201_vm3, 1.0, %v873_v50  ;;  %v113_v54 = vsel %vm97_vm4, 1.0, %v873_v50 }
  0x80   :  { %v232_v55 = vpack.c.bf16 %v217_v53, %v216_v51  ;;  %v128_v56 = vpack.c.bf16 %v113_v54, %v112_v52 }
  0x82   :  { %741 = vmatmul.msk.bf16.vlgmr.msra.gmra.mxu0 %vm248_vm5, %v128_v56  ;;  %753 = vmatmul.msk.bf16.vlgmr.msra.gmra.mxu1 %vm248_vm5, %v128_v56 }
  0x83   :  { %765 = vmatmul.msk.bf16.vlgmr.msra.gmra.mxu2 %vm386_vm6, %v232_v55  ;;  %777 = vmatmul.msk.bf16.vlgmr.msra.gmra.mxu3 %vm386_vm6, %v232_v55 }
  0x84   :  { %v181_v23 = vpop.permute.xlu2 %180 }
  0x85   :  { %v56_v58 = vpop.permute.xlu0 %55  ;;  %v59_v59 = vpop.permute.xlu1 %58 }
  0x86   :  { %vm98_vm7 = vcmp.eq.s32.totalorder %v1033_v46, %v56_v58  ;;  %vm99_vm8 = vcmp.eq.s32.totalorder %v1033_v46, %v59_v59 }
  0x87   :  { %v114_v60 = vsel %vm98_vm7, 1.0, %v873_v50  ;;  %v115_v61 = vsel %vm99_vm8, 1.0, %v873_v50  ;;  %vm209_vm8 = vcmp.eq.s32.totalorder %v1033_v46, %v181_v23  ;;  %v860_v23 = vld [vmem:[%s1266_s7 + $0x8] sm:$0xff]  }
  0x88   :  { %v129_v0 = vpack.c.bf16 %v115_v61, %v114_v60  ;;  %v225_v30 = vsel %vm209_vm8, 1.0, %v873_v50 }
  0x8c   :  { %v184_v29 = vpop.permute.xlu2 %183 }
  0x8d   :  { %v169_v3 = vpop.permute.xlu0 %168  ;;  %v62_v4 = vpop.permute.xlu1 %61 }
  0x8e   :  { %vm100_vm11 = vcmp.eq.s32.totalorder %v1033_v46, %v62_v4  ;;  %vm205_vm12 = vcmp.eq.s32.totalorder %v1033_v46, %v169_v3 }
  0x8f   :  { %v116_v6 = vsel %vm100_vm11, 1.0, %v873_v50  ;;  %v221_v8 = vsel %vm205_vm12, 1.0, %v873_v50  ;;  %vm210_vm12 = vcmp.eq.s32.totalorder %v1033_v46, %v184_v29 }
  0x90   :  { %v130_v11 = vpack.c.bf16 %v117_v9, %v116_v6  ;;  %v234_v12 = vpack.c.bf16 %v221_v8, %v220_v10  ;;  %v226_v40 = vsel %vm210_vm12, 1.0, %v873_v50 }
  0x92   :  { %742 = vmatmul.msk.bf16.gmra.mxu0 %vm248_vm5, %v129_v0  ;;  %754 = vmatmul.msk.bf16.gmra.mxu1 %vm248_vm5, %v129_v0 }
  0x93   :  { %766 = vmatmul.msk.bf16.gmra.mxu2 %vm386_vm6, %v233_v1  ;;  %778 = vmatmul.msk.bf16.gmra.mxu3 %vm386_vm6, %v233_v1 }
  0x94   :  { %v83_v35 = vpop.permute.xlu2 %82 }
  0x95   :  { %v172_v7 = vpop.permute.xlu0 %171  ;;  %v175_v13 = vpop.permute.xlu1 %174  ;;  %vm107_vm11 = vcmp.eq.s32.totalorder %v1033_v46, %v83_v35 }
  0x96   :  { %vm206_vm0 = vcmp.eq.s32.totalorder %v1033_v46, %v172_v7  ;;  %vm207_vm1 = vcmp.eq.s32.totalorder %v1033_v46, %v175_v13  ;;  %v123_v39 = vsel %vm107_vm11, 1.0, %v873_v50 }
  0x97   :  { %v222_v18 = vsel %vm206_vm0, 1.0, %v873_v50  ;;  %v223_v19 = vsel %vm207_vm1, 1.0, %v873_v50 }
  0x98   :  { %v235_v22 = vpack.c.bf16 %v223_v19, %v222_v18  ;;  %v853_v19 = vld [vmem:[%s1265_s6 + $0x8] sm:$0xff]  }
  0x9c   :  { %v86_v45 = vpop.permute.xlu2 %85 }
  0x9d   :  { %v71_v14 = vpop.permute.xlu0 %70  ;;  %v178_v17 = vpop.permute.xlu1 %177  ;;  %vm108_vm0 = vcmp.eq.s32.totalorder %v1033_v46, %v86_v45  ;;  %v854_v45 = vld [vmem:[%s1265_s6 + $0x10] sm:$0xff]  }
  0x9e   :  { %vm103_vm15 = vcmp.eq.s32.totalorder %v1033_v46, %v71_v14  ;;  %vm208_vm7 = vcmp.eq.s32.totalorder %v1033_v46, %v178_v17  ;;  %v124_v52 = vsel %vm108_vm0, 1.0, %v873_v50 }
  0x9f   :  { %v119_v16 = vsel %vm103_vm15, 1.0, %v873_v50  ;;  %v224_v28 = vsel %vm208_vm7, 1.0, %v873_v50 }
  0xa0   :  { %v131_v21 = vpack.c.bf16 %v119_v16, %v118_v20  ;;  %v236_v32 = vpack.c.bf16 %v225_v30, %v224_v28 }
  0xa2   :  { %743 = vmatmul.msk.bf16.gmra.mxu0 %vm248_vm5, %v130_v11  ;;  %755 = vmatmul.msk.bf16.gmra.mxu1 %vm248_vm5, %v130_v11 }
  0xa3   :  { %767 = vmatmul.msk.bf16.gmra.mxu2 %vm386_vm6, %v234_v12  ;;  %779 = vmatmul.msk.bf16.gmra.mxu3 %vm386_vm6, %v234_v12 }
  0xa4   :  { %v199_v57 = vpop.permute.xlu2 %198 }
  0xa5   :  { %v74_v24 = vpop.permute.xlu0 %73  ;;  %v77_v25 = vpop.permute.xlu1 %76 }
  0xa6   :  { %vm104_vm3 = vcmp.eq.s32.totalorder %v1033_v46, %v74_v24  ;;  %vm105_vm4 = vcmp.eq.s32.totalorder %v1033_v46, %v77_v25 }
  0xa7   :  { %v120_v26 = vsel %vm104_vm3, 1.0, %v873_v50  ;;  %v121_v27 = vsel %vm105_vm4, 1.0, %v873_v50  ;;  %vm215_vm4 = vcmp.eq.s32.totalorder %v1033_v46, %v199_v57 }
  0xa8   :  { %v132_v31 = vpack.c.bf16 %v121_v27, %v120_v26  ;;  %v231_v61 = vsel %vm215_vm4, 1.0, %v873_v50  ;;  %v795_v26 = vunpack.c.l.bf16 %v853_v19  ;;  %v827_v27 = vunpack.c.l.bf16 %v860_v23 }
  0xad   :  { %v187_v33 = vpop.permute.xlu0 %186  ;;  %v80_v34 = vpop.permute.xlu1 %79 }
  0xae   :  { %vm106_vm9 = vcmp.eq.s32.totalorder %v1033_v46, %v80_v34  ;;  %vm211_vm10 = vcmp.eq.s32.totalorder %v1033_v46, %v187_v33 }
  0xaf   :  { %v122_v36 = vsel %vm106_vm9, 1.0, %v873_v50  ;;  %v227_v38 = vsel %vm211_vm10, 1.0, %v873_v50 }
  0xb0   :  { %v133_v41 = vpack.c.bf16 %v123_v39, %v122_v36  ;;  %v237_v42 = vpack.c.bf16 %v227_v38, %v226_v40  ;;  %v796_v38 = vunpack.c.h.bf16 %v853_v19  ;;  %v828_v39 = vunpack.c.h.bf16 %v860_v23 }
  0xb2   :  { %744 = vmatmul.msk.bf16.gmra.mxu0 %vm248_vm5, %v131_v21  ;;  %756 = vmatmul.msk.bf16.gmra.mxu1 %vm248_vm5, %v131_v21 }
  0xb3   :  { %768 = vmatmul.msk.bf16.gmra.mxu2 %vm386_vm6, %v235_v22  ;;  %780 = vmatmul.msk.bf16.gmra.mxu3 %vm386_vm6, %v235_v22 }
  0xb5   :  { %v190_v37 = vpop.permute.xlu0 %189  ;;  %v193_v43 = vpop.permute.xlu1 %192 }
  0xb6   :  { %vm212_vm14 = vcmp.eq.s32.totalorder %v1033_v46, %v190_v37  ;;  %vm213_vm15 = vcmp.eq.s32.totalorder %v1033_v46, %v193_v43 }
  0xb7   :  { %v228_v49 = vsel %vm212_vm14, 1.0, %v873_v50  ;;  %v229_v51 = vsel %vm213_vm15, 1.0, %v873_v50 }
  0xb8   :  { %v238_v54 = vpack.c.bf16 %v229_v51, %v228_v49  ;;  %v861_v51 = vld [vmem:[%s1266_s7 + $0x10] sm:$0xff]  }
  0xbd   :  { %v89_v44 = vpop.permute.xlu0 %88  ;;  %v196_v48 = vpop.permute.xlu1 %195 }
  0xbe   :  { %vm109_vm13 = vcmp.eq.s32.totalorder %v1033_v46, %v89_v44  ;;  %vm214_vm3 = vcmp.eq.s32.totalorder %v1033_v46, %v196_v48 }
  0xbf   :  { %v125_v47 = vsel %vm109_vm13, 1.0, %v873_v50  ;;  %v230_v60 = vsel %vm214_vm3, 1.0, %v873_v50 }
  0xc0   :  { %v134_v53 = vpack.c.bf16 %v125_v47, %v124_v52  ;;  %v239_v63 = vpack.c.bf16 %v231_v61, %v230_v60 }
  0xc2   :  { %745 = vmatmul.msk.bf16.gmra.mxu0 %vm248_vm5, %v132_v31  ;;  %757 = vmatmul.msk.bf16.gmra.mxu1 %vm248_vm5, %v132_v31 }
  0xc3   :  { %769 = vmatmul.msk.bf16.gmra.mxu2 %vm386_vm6, %v236_v32  ;;  %781 = vmatmul.msk.bf16.gmra.mxu3 %vm386_vm6, %v236_v32 }
  0xc5   :  { %v92_v55 = vpop.permute.xlu0 %91  ;;  %v95_v56 = vpop.permute.xlu1 %94 }
  0xc6   :  { %vm110_vm1 = vcmp.eq.s32.totalorder %v1033_v46, %v92_v55  ;;  %vm111_vm2 = vcmp.eq.s32.totalorder %v1033_v46, %v95_v56  ;;  %v790_v46 = vld [vmem:[%s1265_s6] sm:$0xff]   ;;  %v831_v55 = vunpack.c.l.bf16 %v861_v51 }
  0xc7   :  { %v126_v58 = vsel %vm110_vm1, 1.0, %v873_v50  ;;  %v127_v59 = vsel %vm111_vm2, 1.0, %v873_v50  ;;  %v822_v50 = vld [vmem:[%s1266_s7] sm:$0xff]   ;;  %v791_v2 = vunpack.c.l.bf16 %v790_v46  ;;  %v792_v12 = vunpack.c.h.bf16 %v790_v46 }
  0xc8   :  { %v135_v62 = vpack.c.bf16 %v127_v59, %v126_v58  ;;  %v823_v3 = vunpack.c.l.bf16 %v822_v50  ;;  %v824_v13 = vunpack.c.h.bf16 %v822_v50  ;;  %v832_v50 = vunpack.c.h.bf16 %v861_v51 }
  0xd2   :  { %746 = vmatmul.msk.bf16.gmra.mxu0 %vm248_vm5, %v133_v41  ;;  %758 = vmatmul.msk.bf16.gmra.mxu1 %vm248_vm5, %v133_v41 }
  0xd3   :  { %770 = vmatmul.msk.bf16.gmra.mxu2 %vm386_vm6, %v237_v42  ;;  %782 = vmatmul.msk.bf16.gmra.mxu3 %vm386_vm6, %v237_v42 }
  0xe2   :  { %747 = vmatmul.msk.bf16.gmra.mxu0 %vm248_vm5, %v134_v53  ;;  %759 = vmatmul.msk.bf16.gmra.mxu1 %vm248_vm5, %v134_v53 }
  0xe3   :  { %771 = vmatmul.msk.bf16.gmra.mxu2 %vm386_vm6, %v238_v54  ;;  %783 = vmatmul.msk.bf16.gmra.mxu3 %vm386_vm6, %v238_v54  ;;  %v799_v54 = vunpack.c.l.bf16 %v854_v45 }
  0xf2   :  { %748 = vmatmul.msk.bf16.gmra.mxu0 %vm248_vm5, %v135_v62  ;;  %760 = vmatmul.msk.bf16.gmra.mxu1 %vm248_vm5, %v135_v62  ;;  %vm667_vm5 = vcmask 261120  }
  0xf3   :  { %772 = vmatmul.msk.bf16.gmra.mxu2 %vm386_vm6, %v239_v63  ;;  %784 = vmatmul.msk.bf16.gmra.mxu3 %vm386_vm6, %v239_v63  ;;  %vm716_vm6 = vcmask 7168  }
  0xff   :  { %v282_v0 = vpop.f32.mrf.mxu0  ;;  %v339_v1 = vpop.f32.mrf.mxu1 }
 0x100   :  { %v555_v4 = vmul.f32 %v791_v2, %v339_v1  ;;  %v800_v1 = vunpack.c.h.bf16 %v854_v45 }
 0x102   :  { %v571_v10 = vadd.f32 %v555_v4, %v282_v0 }
 0x106   :  { %v424_v5 = vpop.f32.mrf.mxu2  ;;  %v483_v6 = vpop.f32.mrf.mxu3 }
 0x107   :  { %v619_v7 = vmul.f32 %v823_v3, %v483_v6  ;;  %v284_v8 = vpop.f32.mrf.mxu0  ;;  %v341_v9 = vpop.f32.mrf.mxu1 }
 0x108   :  { %v556_v15 = vmul.f32 %v792_v12, %v341_v9 }
 0x109   :  { %v635_v11 = vadd.f32 %v619_v7, %v424_v5  ;;  %v855_v7 = vld [vmem:[%s1265_s6 + $0x18] sm:$0xff]  }
 0x10a   :  { %v572_v24 = vadd.f32 %v556_v15, %v284_v8 }
 0x10b   :  { %v651_v14 = vmul.f32 %v635_v11, %v571_v10  ;;  %v862_v11 = vld [vmem:[%s1266_s7 + $0x18] sm:$0xff]  }
 0x10d   :  { %v668_v16 = vsel %vm667_vm5, %v651_v14, 0.0  ;;  %v803_v14 = vunpack.c.l.bf16 %v855_v7 }
 0x10e   :  { %v426_v17 = vpop.f32.mrf.mxu2  ;;  %v485_v18 = vpop.f32.mrf.mxu3  ;;  %669 = vadd.xlane.f32.xlu2 %v668_v16  ;;  %v835_v16 = vunpack.c.l.bf16 %v862_v11 }
 0x10f   :  { %v620_v20 = vmul.f32 %v824_v13, %v485_v18  ;;  %v287_v21 = vpop.f32.mrf.mxu0  ;;  %v344_v22 = vpop.f32.mrf.mxu1 }
 0x110   :  { %v557_v29 = vmul.f32 %v795_v26, %v344_v22  ;;  %v804_v26 = vunpack.c.h.bf16 %v855_v7 }
 0x111   :  { %v636_v25 = vadd.f32 %v620_v20, %v426_v17 }
 0x112   :  { %v573_v36 = vadd.f32 %v557_v29, %v287_v21 }
 0x113   :  { %v652_v28 = vmul.f32 %v636_v25, %v572_v24 }
 0x115   :  { %v671_v30 = vsel %vm667_vm5, %v652_v28, 0.0 }
 0x116   :  { %v429_v31 = vpop.f32.mrf.mxu2  ;;  %v488_v32 = vpop.f32.mrf.mxu3  ;;  %672 = vadd.xlane.f32.xlu0 %v671_v30 }
 0x117   :  { %v621_v33 = vmul.f32 %v827_v27, %v488_v32  ;;  %v289_v34 = vpop.f32.mrf.mxu0  ;;  %v346_v35 = vpop.f32.mrf.mxu1  ;;  %v836_v27 = vunpack.c.h.bf16 %v862_v11 }
 0x118   :  { %v558_v41 = vmul.f32 %v796_v38, %v346_v35 }
 0x119   :  { %v637_v37 = vadd.f32 %v621_v33, %v429_v31  ;;  %v856_v33 = vld [vmem:[%s1265_s6 + $0x20] sm:$0xff]  }
 0x11a   :  { %v574_v52 = vadd.f32 %v558_v41, %v289_v34 }
 0x11b   :  { %v653_v40 = vmul.f32 %v637_v37, %v573_v36  ;;  %v863_v37 = vld [vmem:[%s1266_s7 + $0x20] sm:$0xff]  }
 0x11d   :  { %v674_v42 = vsel %vm667_vm5, %v653_v40, 0.0  ;;  %v807_v40 = vunpack.c.l.bf16 %v856_v33 }
 0x11e   :  { %v431_v43 = vpop.f32.mrf.mxu2  ;;  %v490_v44 = vpop.f32.mrf.mxu3  ;;  %675 = vadd.xlane.f32.xlu1 %v674_v42  ;;  %v839_v42 = vunpack.c.l.bf16 %v863_v37 }
 0x11f   :  { %v622_v47 = vmul.f32 %v828_v39, %v490_v44  ;;  %v292_v48 = vpop.f32.mrf.mxu0  ;;  %v349_v49 = vpop.f32.mrf.mxu1 }
 0x120   :  { %v559_v57 = vmul.f32 %v799_v54, %v349_v49  ;;  %v808_v54 = vunpack.c.h.bf16 %v856_v33 }
 0x121   :  { %v638_v53 = vadd.f32 %v622_v47, %v431_v43 }
 0x122   :  { %v575_v46 = vadd.f32 %v559_v57, %v292_v48 }
 0x123   :  { %v654_v56 = vmul.f32 %v638_v53, %v574_v52 }
 0x125   :  { %v677_v58 = vsel %vm667_vm5, %v654_v56, 0.0 }
 0x126   :  { %v434_v59 = vpop.f32.mrf.mxu2  ;;  %v493_v60 = vpop.f32.mrf.mxu3  ;;  %678 = vadd.xlane.f32.xlu2 %v677_v58 }
 0x127   :  { %v623_v61 = vmul.f32 %v831_v55, %v493_v60  ;;  %v294_v62 = vpop.f32.mrf.mxu0  ;;  %v351_v63 = vpop.f32.mrf.mxu1  ;;  %v840_v55 = vunpack.c.h.bf16 %v863_v37 }
 0x128   :  { %v560_v3 = vmul.f32 %v800_v1, %v351_v63 }
 0x129   :  { %v639_v0 = vadd.f32 %v623_v61, %v434_v59  ;;  %v857_v61 = vld [vmem:[%s1265_s6 + $0x28] sm:$0xff]  }
 0x12a   :  { %v576_v12 = vadd.f32 %v560_v3, %v294_v62 }
 0x12b   :  { %v655_v2 = vmul.f32 %v639_v0, %v575_v46  ;;  %v864_v0 = vld [vmem:[%s1266_s7 + $0x28] sm:$0xff]  }
 0x12c   :  { %v843_v3 = vunpack.c.l.bf16 %v864_v0 }
 0x12d   :  { %v680_v4 = vsel %vm667_vm5, %v655_v2, 0.0  ;;  %v811_v2 = vunpack.c.l.bf16 %v857_v61 }
 0x12e   :  { %v436_v5 = vpop.f32.mrf.mxu2  ;;  %v495_v6 = vpop.f32.mrf.mxu3  ;;  %681 = vadd.xlane.f32.xlu2 %v680_v4 }
 0x12f   :  { %v624_v8 = vmul.f32 %v832_v50, %v495_v6  ;;  %v297_v9 = vpop.f32.mrf.mxu0  ;;  %v354_v10 = vpop.f32.mrf.mxu1 }
 0x130   :  { %v561_v17 = vmul.f32 %v803_v14, %v354_v10  ;;  %v812_v14 = vunpack.c.h.bf16 %v857_v61 }
 0x131   :  { %v640_v13 = vadd.f32 %v624_v8, %v436_v5 }
 0x132   :  { %v577_v24 = vadd.f32 %v561_v17, %v297_v9 }
 0x133   :  { %v656_v15 = vmul.f32 %v640_v13, %v576_v12 }
 0x135   :  { %v683_v18 = vsel %vm667_vm5, %v656_v15, 0.0  ;;  %v844_v15 = vunpack.c.h.bf16 %v864_v0 }
 0x136   :  { %684 = vadd.xlane.f32.xlu0 %v683_v18  ;;  %v439_v19 = vpop.f32.mrf.mxu2  ;;  %v498_v20 = vpop.f32.mrf.mxu3 }
 0x137   :  { %v625_v21 = vmul.f32 %v835_v16, %v498_v20  ;;  %v299_v22 = vpop.f32.mrf.mxu0  ;;  %v356_v23 = vpop.f32.mrf.mxu1 }
 0x138   :  { %v562_v29 = vmul.f32 %v804_v26, %v356_v23 }
 0x139   :  { %v641_v25 = vadd.f32 %v625_v21, %v439_v19  ;;  %v858_v21 = vld [vmem:[%s1265_s6 + $0x30] sm:$0xff]  }
 0x13a   :  { %v578_v38 = vadd.f32 %v562_v29, %v299_v22 }
 0x13b   :  { %v657_v28 = vmul.f32 %v641_v25, %v577_v24  ;;  %v865_v24 = vld [vmem:[%s1266_s7 + $0x30] sm:$0xff]  }
 0x13d   :  { %v686_v30 = vsel %vm667_vm5, %v657_v28, 0.0  ;;  %v815_v28 = vunpack.c.l.bf16 %v858_v21 }
 0x13e   :  { %v500_v31 = vpop.f32.mrf.mxu3  ;;  %687 = vadd.xlane.f32.xlu1 %v686_v30  ;;  %v441_v32 = vpop.f32.mrf.mxu2  ;;  %v847_v30 = vunpack.c.l.bf16 %v865_v24 }
 0x13f   :  { %v626_v34 = vmul.f32 %v836_v27, %v500_v31  ;;  %v302_v35 = vpop.f32.mrf.mxu0  ;;  %v359_v36 = vpop.f32.mrf.mxu1 }
 0x140   :  { %v563_v43 = vmul.f32 %v807_v40, %v359_v36 }
 0x141   :  { %v642_v39 = vadd.f32 %v626_v34, %v441_v32 }
 0x142   :  { %v579_v52 = vadd.f32 %v563_v43, %v302_v35 }
 0x143   :  { %v658_v41 = vmul.f32 %v642_v39, %v578_v38  ;;  %v816_v39 = vunpack.c.h.bf16 %v858_v21 }
 0x145   :  { %v689_v44 = vsel %vm667_vm5, %v658_v41, 0.0  ;;  %v848_v41 = vunpack.c.h.bf16 %v865_v24 }
 0x146   :  { %690 = vadd.xlane.f32.xlu2 %v689_v44  ;;  %v444_v45 = vpop.f32.mrf.mxu2  ;;  %v503_v47 = vpop.f32.mrf.mxu3 }
 0x147   :  { %v627_v48 = vmul.f32 %v839_v42, %v503_v47  ;;  %v304_v49 = vpop.f32.mrf.mxu0  ;;  %v361_v51 = vpop.f32.mrf.mxu1 }
 0x148   :  { %v564_v57 = vmul.f32 %v808_v54, %v361_v51 }
 0x149   :  { %v643_v53 = vadd.f32 %v627_v48, %v444_v45  ;;  %v859_v48 = vld [vmem:[%s1265_s6 + $0x38] sm:$0xff]  }
 0x14a   :  { %v580_v1 = vadd.f32 %v564_v57, %v304_v49 }
 0x14b   :  { %v659_v56 = vmul.f32 %v643_v53, %v579_v52  ;;  %v866_v52 = vld [vmem:[%s1266_s7 + $0x38] sm:$0xff]  }
 0x14c   :  { %v851_v57 = vunpack.c.l.bf16 %v866_v52 }
 0x14d   :  { %v692_v58 = vsel %vm667_vm5, %v659_v56, 0.0 }
 0x14e   :  { %v446_v59 = vpop.f32.mrf.mxu2  ;;  %v505_v60 = vpop.f32.mrf.mxu3  ;;  %693 = vadd.xlane.f32.xlu0 %v692_v58 }
 0x14f   :  { %v628_v62 = vmul.f32 %v840_v55, %v505_v60  ;;  %v307_v63 = vpop.f32.mrf.mxu0  ;;  %v364_v46 = vpop.f32.mrf.mxu1  ;;  %v819_v55 = vunpack.c.l.bf16 %v859_v48 }
 0x150   :  { %v565_v5 = vmul.f32 %v811_v2, %v364_v46  ;;  %v852_v2 = vunpack.c.h.bf16 %v866_v52 }
 0x151   :  { %v644_v50 = vadd.f32 %v628_v62, %v446_v59 }
 0x152   :  { %v581_v12 = vadd.f32 %v565_v5, %v307_v63 }
 0x153   :  { %v660_v4 = vmul.f32 %v644_v50, %v580_v1  ;;  %v820_v1 = vunpack.c.h.bf16 %v859_v48 }
 0x155   :  { %v695_v6 = vsel %vm667_vm5, %v660_v4, 0.0 }
 0x156   :  { %v449_v7 = vpop.f32.mrf.mxu2  ;;  %v508_v8 = vpop.f32.mrf.mxu3  ;;  %696 = vadd.xlane.f32.xlu1 %v695_v6 }
 0x157   :  { %v629_v9 = vmul.f32 %v843_v3, %v508_v8  ;;  %v309_v10 = vpop.f32.mrf.mxu0  ;;  %v366_v11 = vpop.f32.mrf.mxu1 }
 0x158   :  { %v566_v17 = vmul.f32 %v812_v14, %v366_v11 }
 0x159   :  { %v645_v13 = vadd.f32 %v629_v9, %v449_v7 }
 0x15a   :  { %v582_v25 = vadd.f32 %v566_v17, %v309_v10 }
 0x15b   :  { %v661_v16 = vmul.f32 %v645_v13, %v581_v12 }
 0x15d   :  { %v698_v18 = vsel %vm667_vm5, %v661_v16, 0.0 }
 0x15e   :  { %v451_v19 = vpop.f32.mrf.mxu2  ;;  %v510_v20 = vpop.f32.mrf.mxu3  ;;  %699 = vadd.xlane.f32.xlu2 %v698_v18 }
 0x15f   :  { %v630_v22 = vmul.f32 %v844_v15, %v510_v20  ;;  %v369_v23 = vpop.f32.mrf.mxu1  ;;  %v312_v27 = vpop.f32.mrf.mxu0 }
 0x160   :  { %v567_v31 = vmul.f32 %v815_v28, %v369_v23 }
 0x161   :  { %v646_v26 = vadd.f32 %v630_v22, %v451_v19 }
 0x162   :  { %v583_v37 = vadd.f32 %v567_v31, %v312_v27 }
 0x163   :  { %v662_v29 = vmul.f32 %v646_v26, %v582_v25 }
 0x165   :  { %v701_v32 = vsel %vm667_vm5, %v662_v29, 0.0 }
 0x166   :  { %702 = vadd.xlane.f32.xlu0 %v701_v32  ;;  %v454_v33 = vpop.f32.mrf.mxu2  ;;  %v513_v34 = vpop.f32.mrf.mxu3 }
 0x167   :  { %v631_v35 = vmul.f32 %v847_v30, %v513_v34  ;;  %v371_v36 = vpop.f32.mrf.mxu1  ;;  %v314_v40 = vpop.f32.mrf.mxu0 }
 0x168   :  { %v568_v43 = vmul.f32 %v816_v39, %v371_v36 }
 0x169   :  { %v647_v38 = vadd.f32 %v631_v35, %v454_v33 }
 0x16a   :  { %v584_v53 = vadd.f32 %v568_v43, %v314_v40 }
 0x16b   :  { %v663_v42 = vmul.f32 %v647_v38, %v583_v37 }
 0x16d   :  { %v704_v44 = vsel %vm667_vm5, %v663_v42, 0.0 }
 0x16e   :  { %v515_v45 = vpop.f32.mrf.mxu3  ;;  %705 = vadd.xlane.f32.xlu1 %v704_v44  ;;  %v456_v47 = vpop.f32.mrf.mxu2 }
 0x16f   :  { %v632_v49 = vmul.f32 %v848_v41, %v515_v45  ;;  %v374_v51 = vpop.f32.mrf.mxu1  ;;  %v317_v58 = vpop.f32.mrf.mxu0 }
 0x170   :  { %v569_v59 = vmul.f32 %v819_v55, %v374_v51 }
 0x171   :  { %v648_v54 = vadd.f32 %v632_v49, %v456_v47 }
 0x172   :  { %v585_v46 = vadd.f32 %v569_v59, %v317_v58 }
 0x173   :  { %v664_v56 = vmul.f32 %v648_v54, %v584_v53 }
 0x175   :  { %v707_v60 = vsel %vm667_vm5, %v664_v56, 0.0 }
 0x176   :  { %708 = vadd.xlane.f32.xlu2 %v707_v60  ;;  %v459_v61 = vpop.f32.mrf.mxu2  ;;  %v518_v62 = vpop.f32.mrf.mxu3 }
 0x177   :  { %v633_v63 = vmul.f32 %v851_v57, %v518_v62  ;;  %v376_v50 = vpop.f32.mrf.mxu1  ;;  %v319_v8 = vpop.f32.mrf.mxu0 }
 0x178   :  { %v570_v4 = vmul.f32 %v820_v1, %v376_v50 }
 0x179   :  { %v649_v0 = vadd.f32 %v633_v63, %v459_v61 }
 0x17a   :  { %v586_v10 = vadd.f32 %v570_v4, %v319_v8 }
 0x17b   :  { %v665_v3 = vmul.f32 %v649_v0, %v585_v46 }
 0x17d   :  { %v710_v5 = vsel %vm667_vm5, %v665_v3, 0.0 }
 0x17e   :  { %v520_v6 = vpop.f32.mrf.mxu3  ;;  %711 = vadd.xlane.f32.xlu0 %v710_v5  ;;  %v461_v9 = vpop.f32.mrf.mxu2 }
 0x17f   :  { %v634_v7 = vmul.f32 %v852_v2, %v520_v6 }
 0x181   :  { %v650_v11 = vadd.f32 %v634_v7, %v461_v9  ;;  %v670_v12 = vpop.xlane.xlu2 %669 }
 0x182   :  { %717 = vst.msk [vmem:[%s1267_s8] sm:$0xff] %vm716_vm6, %v670_v12 }
 0x183   :  { %v666_v13 = vmul.f32 %v650_v11, %v586_v10 }
 0x185   :  { %v713_v14 = vsel %vm667_vm5, %v666_v13, 0.0 }
 0x186   :  { %714 = vadd.xlane.f32.xlu1 %v713_v14 }
 0x189   :  { %v673_v15 = vpop.xlane.xlu0 %672 }
 0x18a   :  { %718 = vst.msk [vmem:[%s1267_s8 + $0x8] sm:$0xff] %vm716_vm6, %v673_v15 }
 0x191   :  { %v676_v16 = vpop.xlane.xlu1 %675 }
 0x192   :  { %719 = vst.msk [vmem:[%s1267_s8 + $0x10] sm:$0xff] %vm716_vm6, %v676_v16 }
 0x199   :  { %v679_v17 = vpop.xlane.xlu2 %678 }
 0x19a   :  { %720 = vst.msk [vmem:[%s1267_s8 + $0x18] sm:$0xff] %vm716_vm6, %v679_v17 }
 0x1a1   :  { %v682_v18 = vpop.xlane.xlu2 %681 }
 0x1a2   :  { %721 = vst.msk [vmem:[%s1267_s8 + $0x20] sm:$0xff] %vm716_vm6, %v682_v18 }
 0x1a9   :  { %v685_v19 = vpop.xlane.xlu0 %684 }
 0x1aa   :  { %722 = vst.msk [vmem:[%s1267_s8 + $0x28] sm:$0xff] %vm716_vm6, %v685_v19 }
 0x1b1   :  { %v688_v20 = vpop.xlane.xlu1 %687 }
 0x1b2   :  { %723 = vst.msk [vmem:[%s1267_s8 + $0x30] sm:$0xff] %vm716_vm6, %v688_v20 }
 0x1b9   :  { %v691_v21 = vpop.xlane.xlu2 %690 }
 0x1ba   :  { %724 = vst.msk [vmem:[%s1267_s8 + $0x38] sm:$0xff] %vm716_vm6, %v691_v21 }
 0x1c1   :  { %v694_v22 = vpop.xlane.xlu0 %693 }
 0x1c2   :  { %725 = vst.msk [vmem:[%s1267_s8 + $0x40] sm:$0xff] %vm716_vm6, %v694_v22 }
 0x1c9   :  { %v697_v23 = vpop.xlane.xlu1 %696 }
 0x1ca   :  { %726 = vst.msk [vmem:[%s1267_s8 + $0x48] sm:$0xff] %vm716_vm6, %v697_v23 }
 0x1d1   :  { %v700_v24 = vpop.xlane.xlu2 %699 }
 0x1d2   :  { %727 = vst.msk [vmem:[%s1267_s8 + $0x50] sm:$0xff] %vm716_vm6, %v700_v24 }
 0x1d9   :  { %v703_v25 = vpop.xlane.xlu0 %702 }
 0x1da   :  { %728 = vst.msk [vmem:[%s1267_s8 + $0x58] sm:$0xff] %vm716_vm6, %v703_v25 }
 0x1e1   :  { %v706_v26 = vpop.xlane.xlu1 %705 }
 0x1e2   :  { %729 = vst.msk [vmem:[%s1267_s8 + $0x60] sm:$0xff] %vm716_vm6, %v706_v26 }
 0x1e9   :  { %v709_v27 = vpop.xlane.xlu2 %708 }
 0x1ea   :  { %730 = vst.msk [vmem:[%s1267_s8 + $0x68] sm:$0xff] %vm716_vm6, %v709_v27 }
 0x1f1   :  { %v712_v28 = vpop.xlane.xlu0 %711 }
 0x1f2   :  { %731 = vst.msk [vmem:[%s1267_s8 + $0x70] sm:$0xff] %vm716_vm6, %v712_v28 }
 0x1f9   :  { %v715_v29 = vpop.xlane.xlu1 %714 }
 0x1fa   :  { %732 = vst.msk [vmem:[%s1267_s8 + $0x78] sm:$0xff] %vm716_vm6, %v715_v29 }

</bundles_post_ra>
